<compile_context>
chip_gen: v5e
topology: v5e:2x2
jax: 0.10.0
libtpu: 0.0.40
codegen_flags: <defaults>
</compile_context>

<pallas_src>
import functools

import jax
import jax.numpy as jnp
from jax import lax
from jax.experimental import pallas as pl
from jax.experimental.pallas import tpu as pltpu

N_CLASSES = 4        # real output classes of the PyTorch module
IN_FEATURES = 16     # nn.Linear(16, channels)
LANE = 128           # TPU lane width
SUBLANE = 8          # f32 sublane count
_UNROLL_MAX = 8      # statically unroll mid_block when blocks <= this
_NEG_INF = -1e30


def _round_up(x, m):
    return (x + m - 1) // m * m


def _nbytes(a):
    return int(a.size) * a.dtype.itemsize


def _vmem_capacity_bytes():
    """Physical VMEM per TensorCore; conservative fallback if query fails."""
    try:
        return max(int(pltpu.get_tpu_info().vmem_capacity_bytes), 48 * 2**20)
    except Exception:                       # pragma: no cover - env dependent
        return 64 * 2**20                   # v7x per-TensorCore VMEM


# ---------------------------------------------------------------------------
# Kernel building blocks (shared between resident and streamed variants)
# ---------------------------------------------------------------------------
def _in_block(x_ref, w_in_ref, b_in_ref, cdt):
    h = jnp.dot(x_ref[...].astype(cdt), w_in_ref[...],
                preferred_element_type=jnp.float32)
    return jnp.maximum(h + b_in_ref[...].astype(jnp.float32), 0.0)


def _mid_layer(h, w, b, cdt):
    y = jnp.dot(h.astype(cdt), w, preferred_element_type=jnp.float32)
    return jnp.maximum(y + b.astype(jnp.float32), 0.0)


def _out_block(h, w_out_ref, b_out_ref, o_ref, cdt):
    logits = jnp.dot(h.astype(cdt), w_out_ref[...],
                     preferred_element_type=jnp.float32)
    logits = logits + b_out_ref[...].astype(jnp.float32)
    lane = lax.broadcasted_iota(jnp.int32, logits.shape, 1)
    logits = jnp.where(lane < N_CLASSES, logits, _NEG_INF)   # mask pad lanes
    m = jnp.max(logits, axis=1, keepdims=True)
    z = logits - m
    lse = jnp.log(jnp.sum(jnp.exp(z), axis=1, keepdims=True))
    o_ref[...] = (z - lse).astype(o_ref.dtype)


# ---------------------------------------------------------------------------
# Kernels
# ---------------------------------------------------------------------------
def _resident_kernel_mid(blocks, cdt, x_ref, w_in_ref, b_in_ref, w_mid_ref,
                         b_mid_ref, w_out_ref, b_out_ref, o_ref):
    h = _in_block(x_ref, w_in_ref, b_in_ref, cdt)
    if blocks <= _UNROLL_MAX:
        for i in range(blocks):                      # static unroll
            h = _mid_layer(h, w_mid_ref[i], b_mid_ref[i], cdt)
    else:
        def body(i, hc):
            return _mid_layer(hc, w_mid_ref[i], b_mid_ref[i], cdt)
        h = lax.fori_loop(0, blocks, body, h, unroll=2)
    _out_block(h, w_out_ref, b_out_ref, o_ref, cdt)


def _resident_kernel_nomid(cdt, x_ref, w_in_ref, b_in_ref, w_out_ref,
                           b_out_ref, o_ref):
    h = _in_block(x_ref, w_in_ref, b_in_ref, cdt)
    _out_block(h, w_out_ref, b_out_ref, o_ref, cdt)


def _streamed_kernel(cdt, x_ref, w_in_ref, b_in_ref, w_mid_ref, b_mid_ref,
                     w_out_ref, b_out_ref, o_ref, h_ref):
    """grid = (batch_tiles, blocks): one mid layer per step, w_mid streamed."""
    layer = pl.program_id(1)

    @pl.when(layer == 0)
    def _():
        h_ref[...] = _in_block(x_ref, w_in_ref, b_in_ref, cdt)

    h_ref[...] = _mid_layer(h_ref[...], w_mid_ref[...], b_mid_ref[...], cdt)

    @pl.when(layer == pl.num_programs(1) - 1)
    def _():
        _out_block(h_ref[...], w_out_ref, b_out_ref, o_ref, cdt)


# ---------------------------------------------------------------------------
# Parameter handling (padding/casting done ONCE, not per forward call)
# ---------------------------------------------------------------------------
def init_params(key, channels, blocks, dtype=jnp.float32):
    """Deterministic synthetic parameters (shapes match the PyTorch module,
    weights stored pre-transposed as [in, out])."""
    ks = jax.random.split(key, 6)
    scale_in = 1.0 / jnp.sqrt(16.0)
    scale_c = 1.0 / jnp.sqrt(float(channels))
    params = {
        "w_in": jax.random.uniform(ks[0], (IN_FEATURES, channels), dtype,
                                   -scale_in, scale_in),
        "b_in": jax.random.uniform(ks[1], (1, channels), dtype,
                                   -scale_in, scale_in),
        "w_out": jax.random.uniform(ks[2], (channels, N_CLASSES), dtype,
                                    -scale_c, scale_c),
        "b_out": jax.random.uniform(ks[3], (1, N_CLASSES), dtype,
                                    -scale_c, scale_c),
    }
    if blocks > 0:
        params["w_mid"] = jax.random.uniform(
            ks[4], (blocks, channels, channels), dtype, -scale_c, scale_c)
        params["b_mid"] = jax.random.uniform(
            ks[5], (blocks, 1, channels), dtype, -scale_c, scale_c)
    return params


def prepare_params(params, *, blocks, weight_dtype=jnp.float32):
    """Lane-pad and cast parameters once (outside the hot path).

    Weights go to `weight_dtype` (f32 or bf16 MXU operands); biases stay f32.
    Zero-padding is numerically exact.
    """
    C = params["w_in"].shape[1]
    c_pad = _round_up(C, LANE)
    n_pad = LANE                      # lane-dense output slab
    f32 = jnp.float32
    prep = {
        "w_in": jnp.zeros((IN_FEATURES, c_pad), weight_dtype)
                   .at[:, :C].set(params["w_in"].astype(weight_dtype)),
        "b_in": jnp.zeros((1, c_pad), f32)
                   .at[:, :C].set(params["b_in"].astype(f32)),
        "w_out": jnp.zeros((c_pad, n_pad), weight_dtype)
                    .at[:C, :N_CLASSES].set(params["w_out"].astype(weight_dtype)),
        "b_out": jnp.zeros((1, n_pad), f32)
                    .at[:, :N_CLASSES].set(params["b_out"].astype(f32)),
    }
    if blocks > 0:
        prep["w_mid"] = jnp.zeros((blocks, c_pad, c_pad), weight_dtype)\
            .at[:, :C, :C].set(params["w_mid"].astype(weight_dtype))
        prep["b_mid"] = jnp.zeros((blocks, 1, c_pad), f32)\
            .at[:, :, :C].set(params["b_mid"].astype(f32))
    return prep


# ---------------------------------------------------------------------------
# Forward wrapper
# ---------------------------------------------------------------------------
def _const_spec(shape, grid_rank):
    """BlockSpec whose block index is always 0 -> stays resident in VMEM."""
    zeros = (0,) * len(shape)
    if grid_rank == 1:
        return pl.BlockSpec(shape, lambda i: zeros)
    return pl.BlockSpec(shape, lambda i, l: zeros)


def _choose_tile_b(B, tile_b):
    if tile_b is None:
        # Bigger tiles amortize per-grid-step overhead and lengthen the matmul
        # M dim (review: 512+ element tiles reach ~85% of roofline).
        tile_b = min(_round_up(B, SUBLANE), 512)
    tile_b = max(SUBLANE, _round_up(tile_b, SUBLANE))
    n_tiles = pl.cdiv(B, tile_b)
    # v7x has two TensorCores: keep an even number of tiles on the "parallel"
    # batch axis so neither core idles on a straggler tile.
    if n_tiles > 1 and n_tiles % 2 == 1:
        cand = max(SUBLANE, _round_up(pl.cdiv(B, n_tiles + 1), SUBLANE))
        if pl.cdiv(B, cand) % 2 == 0:
            tile_b = cand
            n_tiles = pl.cdiv(B, cand)
    return tile_b, n_tiles * tile_b, n_tiles


def densenet_forward(x, prep, *, blocks, tile_b=None, force_stream=False):
    """DenseNet forward.  `prep` must come from prepare_params().

    x: [B, 16] float32.  Returns [B, 4] log-probabilities.
    """
    B, f_in = x.shape
    assert f_in == IN_FEATURES
    c_pad = prep["w_in"].shape[1]
    n_pad = prep["w_out"].shape[1]
    cdt = prep["w_in"].dtype                       # MXU operand dtype
    out_dtype = x.dtype
    itemsize = jnp.dtype(out_dtype).itemsize

    tile_b, b_pad, n_tiles = _choose_tile_b(B, tile_b)
    # Only the batch dim may need padding; K stays at 16 (full last dim).
    xp = x if b_pad == B else (
        jnp.zeros((b_pad, IN_FEATURES), x.dtype).at[:B].set(x))

    weight_keys = ["w_in", "b_in", "w_out", "b_out"]
    if blocks > 0:
        weight_keys += ["w_mid", "b_mid"]
    weight_bytes = sum(_nbytes(prep[k]) for k in weight_keys)
    nonmid_bytes = sum(_nbytes(prep[k])
                       for k in ("w_in", "b_in", "w_out", "b_out"))
    mid_bytes = weight_bytes - nonmid_bytes

    phys_vmem = _vmem_capacity_bytes()
    act_bytes = (2 * tile_b * (IN_FEATURES + n_pad) + 3 * tile_b * c_pad) * 4
    # Pallas double-buffers inputs by default -> 2x resident weight footprint.
    resident_bytes = 2 * weight_bytes + act_bytes
    use_stream = blocks > 0 and (force_stream
                                 or resident_bytes > int(0.7 * phys_vmem))

    if not use_stream:
        # ---- all weights resident across the 1-D batch-tile grid ----
        grid = (n_tiles,)
        dim_sem = ("parallel",)
        x_spec = pl.BlockSpec((tile_b, IN_FEATURES), lambda i: (i, 0))
        out_specs = pl.BlockSpec((tile_b, n_pad), lambda i: (i, 0))
        scratch_shapes = ()
        if blocks > 0:
            kernel = functools.partial(_resident_kernel_mid, blocks, cdt)
            args = (xp, prep["w_in"], prep["b_in"], prep["w_mid"],
                    prep["b_mid"], prep["w_out"], prep["b_out"])
            in_specs = [x_spec] + [_const_spec(prep[k].shape, 1)
                                   for k in ("w_in", "b_in", "w_mid",
                                             "b_mid", "w_out", "b_out")]
        else:
            kernel = functools.partial(_resident_kernel_nomid, cdt)
            args = (xp, prep["w_in"], prep["b_in"], prep["w_out"],
                    prep["b_out"])
            in_specs = [x_spec] + [_const_spec(prep[k].shape, 1)
                                   for k in ("w_in", "b_in", "w_out", "b_out")]
        needed = resident_bytes + 4 * 2**20
        mid_hbm_reads = 1
    else:
        # ---- stream w_mid one layer at a time (layer grid axis) ----
        grid = (n_tiles, blocks)
        dim_sem = ("parallel", "arbitrary")
        kernel = functools.partial(_streamed_kernel, cdt)
        args = (xp, prep["w_in"], prep["b_in"], prep["w_mid"],
                prep["b_mid"], prep["w_out"], prep["b_out"])
        in_specs = [
            pl.BlockSpec((tile_b, IN_FEATURES), lambda i, l: (i, 0)),
            _const_spec(prep["w_in"].shape, 2),
            _const_spec(prep["b_in"].shape, 2),
            pl.BlockSpec((None, c_pad, c_pad), lambda i, l: (l, 0, 0)),
            pl.BlockSpec((None, 1, c_pad), lambda i, l: (l, 0, 0)),
            _const_spec(prep["w_out"].shape, 2),
            _const_spec(prep["b_out"].shape, 2),
        ]
        out_specs = pl.BlockSpec((tile_b, n_pad), lambda i, l: (i, 0))
        scratch_shapes = [pltpu.VMEM((tile_b, c_pad), jnp.float32)]
        layer_bytes = mid_bytes // blocks
        needed = (2 * nonmid_bytes + 2 * layer_bytes + act_bytes
                  + tile_b * c_pad * 4 + 4 * 2**20)
        mid_hbm_reads = n_tiles          # w_mid re-streamed per batch tile

    # Clamp to physical VMEM minus headroom (v7x is only 64 MiB / TensorCore).
    vmem_limit = int(min(max(needed, 32 * 2**20), phys_vmem - 8 * 2**20))

    flops = 2 * b_pad * (IN_FEATURES * c_pad + blocks * c_pad * c_pad
                         + c_pad * n_pad)
    cost = pl.CostEstimate(
        flops=flops,
        transcendentals=b_pad * (n_pad + 1),
        bytes_accessed=nonmid_bytes + mid_hbm_reads * mid_bytes
                       + (b_pad * IN_FEATURES + b_pad * n_pad) * itemsize,
    )

    out = pl.pallas_call(
        kernel,
        out_shape=jax.ShapeDtypeStruct((b_pad, n_pad), out_dtype),
        grid=grid,
        in_specs=in_specs,
        out_specs=out_specs,
        scratch_shapes=scratch_shapes,
        compiler_params=pltpu.CompilerParams(
            dimension_semantics=dim_sem,
            vmem_limit_bytes=vmem_limit,
        ),
        cost_estimate=cost,
    )(*args)

    return out[:B, :N_CLASSES]


# ---------------------------------------------------------------------------
# Pure-JAX reference (mirrors the PyTorch forward)
# ---------------------------------------------------------------------------
def densenet_reference(x, params, *, blocks):
    h = jnp.maximum(x @ params["w_in"] + params["b_in"], 0.0)
    for i in range(blocks):
        h = jnp.maximum(h @ params["w_mid"][i] + params["b_mid"][i], 0.0)
    logits = h @ params["w_out"] + params["b_out"]
    return jax.nn.log_softmax(logits, axis=1)


if __name__ == "__main__":
    key = jax.random.PRNGKey(0)
    configs = [
        # no mid_block
        dict(channels=16, blocks=0, batch=8, wdt=jnp.float32,
             force_stream=False, tol=2e-5),
        # statically unrolled mid_block
        dict(channels=16, blocks=2, batch=8, wdt=jnp.float32,
             force_stream=False, tol=2e-5),
        # deep stack -> fori_loop(unroll=2) path
        dict(channels=16, blocks=10, batch=8, wdt=jnp.float32,
             force_stream=False, tol=2e-5),
        # streamed-w_mid path (layer grid axis), forced at small size
        dict(channels=16, blocks=3, batch=16, wdt=jnp.float32,
             force_stream=True, tol=2e-5),
        # bf16 weights on the MXU, f32 accumulation
        dict(channels=16, blocks=2, batch=8, wdt=jnp.bfloat16,
             force_stream=False, tol=1e-1),
    ]
    for cfg in configs:
        k_x, k_p, key = jax.random.split(key, 3)
        x = jax.random.normal(k_x, (cfg["batch"], IN_FEATURES), jnp.float32)
        raw = init_params(k_p, cfg["channels"], cfg["blocks"])
        prep = prepare_params(raw, blocks=cfg["blocks"],
                              weight_dtype=cfg["wdt"])

        out = densenet_forward(x, prep, blocks=cfg["blocks"],
                               force_stream=cfg["force_stream"])
        out = jax.block_until_ready(out)

        ref = densenet_reference(x, raw, blocks=cfg["blocks"])
        assert out.shape == (cfg["batch"], N_CLASSES)
        assert jnp.allclose(out, ref, atol=cfg["tol"], rtol=cfg["tol"]), (
            f"mismatch vs reference for {cfg}")

    print("KERNEL_OK")
</pallas_src>

<mosaic_0001>
module attributes {stable_mosaic.version = 11 : i64} {
  func.func @_resident_kernel_nomid(%arg0: i32, %arg1: memref<8x16xf32, #tpu.memory_space<vmem>>, %arg2: memref<16x128xf32, #tpu.memory_space<vmem>>, %arg3: memref<1x128xf32, #tpu.memory_space<vmem>>, %arg4: memref<128x128xf32, #tpu.memory_space<vmem>>, %arg5: memref<1x128xf32, #tpu.memory_space<vmem>>, %arg6: memref<8x128xf32, #tpu.memory_space<vmem>>) attributes {dimension_semantics = [#tpu.dimension_semantics<parallel>], iteration_bounds = array<i64: 1>, scalar_prefetch = 0 : i64, scratch_operands = 0 : i64, tpu.core_type = #tpu.core_type<tc>, window_params = [{transform_indices = @transform_0, window_bounds = array<i64: 8, 16>}, {pipeline_mode = #tpu.pipeline_mode<synchronous>, transform_indices = @transform_1, window_bounds = array<i64: 16, 128>}, {pipeline_mode = #tpu.pipeline_mode<synchronous>, transform_indices = @transform_2, window_bounds = array<i64: 1, 128>}, {pipeline_mode = #tpu.pipeline_mode<synchronous>, transform_indices = @transform_3, window_bounds = array<i64: 128, 128>}, {pipeline_mode = #tpu.pipeline_mode<synchronous>, transform_indices = @transform_4, window_bounds = array<i64: 1, 128>}, {transform_indices = @transform_5, window_bounds = array<i64: 8, 128>}]} {
    %c0 = arith.constant 0 : index
    %c0_0 = arith.constant 0 : index
    %0 = vector.load %arg1[%c0, %c0_0] : memref<8x16xf32, #tpu.memory_space<vmem>>, vector<8x16xf32>
    %c0_1 = arith.constant 0 : index
    %c0_2 = arith.constant 0 : index
    %1 = vector.load %arg2[%c0_1, %c0_2] : memref<16x128xf32, #tpu.memory_space<vmem>>, vector<16x128xf32>
    %cst = arith.constant dense<0.000000e+00> : vector<8x128xf32>
    %2 = tpu.matmul %0, %1, %cst {dimension_numbers = #tpu.dot_dimension_numbers<[1], [0], [0], [1], [0, 0, 1, 1], [], []>} : vector<8x16xf32>, vector<16x128xf32>, vector<8x128xf32> -> vector<8x128xf32>
    %c0_3 = arith.constant 0 : index
    %c0_4 = arith.constant 0 : index
    %3 = vector.load %arg3[%c0_3, %c0_4] : memref<1x128xf32, #tpu.memory_space<vmem>>, vector<1x128xf32>
    %4 = vector.broadcast %3 : vector<1x128xf32> to vector<8x128xf32>
    %5 = arith.addf %2, %4 : vector<8x128xf32>
    %cst_5 = arith.constant 0.000000e+00 : f32
    %6 = vector.broadcast %cst_5 : f32 to vector<8x128xf32>
    %7 = arith.maximumf %5, %6 : vector<8x128xf32>
    %c0_6 = arith.constant 0 : index
    %c0_7 = arith.constant 0 : index
    %8 = vector.load %arg4[%c0_6, %c0_7] : memref<128x128xf32, #tpu.memory_space<vmem>>, vector<128x128xf32>
    %cst_8 = arith.constant dense<0.000000e+00> : vector<8x128xf32>
    %9 = tpu.matmul %7, %8, %cst_8 {dimension_numbers = #tpu.dot_dimension_numbers<[1], [0], [0], [1], [0, 0, 1, 1], [], []>} : vector<8x128xf32>, vector<128x128xf32>, vector<8x128xf32> -> vector<8x128xf32>
    %c0_9 = arith.constant 0 : index
    %c0_10 = arith.constant 0 : index
    %10 = vector.load %arg5[%c0_9, %c0_10] : memref<1x128xf32, #tpu.memory_space<vmem>>, vector<1x128xf32>
    %11 = vector.broadcast %10 : vector<1x128xf32> to vector<8x128xf32>
    %12 = arith.addf %9, %11 : vector<8x128xf32>
    %13 = tpu.iota {dimensions = array<i32: 1>} : vector<8x128xi32>
    %c4_i32 = arith.constant 4 : i32
    %14 = vector.broadcast %c4_i32 : i32 to vector<8x128xi32>
    %15 = arith.cmpi slt, %13, %14 : vector<8x128xi32>
    %cst_11 = arith.constant -1.000000e+30 : f32
    %16 = vector.broadcast %cst_11 : f32 to vector<8x128xf32>
    %17 = arith.select %15, %12, %16 : vector<8x128xi1>, vector<8x128xf32>
    %cst_12 = arith.constant dense<0xFF800000> : vector<8xf32>
    %18 = vector.multi_reduction <maximumf>, %17, %cst_12 [1] : vector<8x128xf32> to vector<8xf32>
    %19 = vector.shape_cast %18 : vector<8xf32> to vector<8x1xf32>
    %20 = vector.broadcast %19 : vector<8x1xf32> to vector<8x128xf32>
    %21 = arith.subf %17, %20 : vector<8x128xf32>
    %22 = math.exp %21 : vector<8x128xf32>
    %cst_13 = arith.constant dense<0.000000e+00> : vector<8xf32>
    %23 = vector.multi_reduction <add>, %22, %cst_13 [1] : vector<8x128xf32> to vector<8xf32>
    %24 = vector.shape_cast %23 : vector<8xf32> to vector<8x1xf32>
    %25 = math.log %24 : vector<8x1xf32>
    %26 = vector.broadcast %25 : vector<8x1xf32> to vector<8x128xf32>
    %27 = arith.subf %21, %26 : vector<8x128xf32>
    %c0_14 = arith.constant 0 : index
    %c0_15 = arith.constant 0 : index
    %28 = vector.load %arg6[%c0_14, %c0_15] : memref<8x128xf32, #tpu.memory_space<vmem>>, vector<8x128xf32>
    tpu.vector_store %arg6[%c0_14, %c0_15], %27 {strides = array<i32>} : memref<8x128xf32, #tpu.memory_space<vmem>>, vector<8x128xf32>,
    return
  }
  func.func @transform_0(%arg0: i32) -> (i32, i32) {
    %c0_i32 = arith.constant 0 : i32
    %c0_i32_0 = arith.constant 0 : i32
    return %arg0, %c0_i32 : i32, i32
  }
  func.func @transform_1(%arg0: i32) -> (i32, i32) {
    %c0_i32 = arith.constant 0 : i32
    %c0_i32_0 = arith.constant 0 : i32
    %c0_i32_1 = arith.constant 0 : i32
    return %c0_i32, %c0_i32_0 : i32, i32
  }
  func.func @transform_2(%arg0: i32) -> (i32, i32) {
    %c0_i32 = arith.constant 0 : i32
    %c0_i32_0 = arith.constant 0 : i32
    %c0_i32_1 = arith.constant 0 : i32
    return %c0_i32, %c0_i32_0 : i32, i32
  }
  func.func @transform_3(%arg0: i32) -> (i32, i32) {
    %c0_i32 = arith.constant 0 : i32
    %c0_i32_0 = arith.constant 0 : i32
    %c0_i32_1 = arith.constant 0 : i32
    return %c0_i32, %c0_i32_0 : i32, i32
  }
  func.func @transform_4(%arg0: i32) -> (i32, i32) {
    %c0_i32 = arith.constant 0 : i32
    %c0_i32_0 = arith.constant 0 : i32
    %c0_i32_1 = arith.constant 0 : i32
    return %c0_i32, %c0_i32_0 : i32, i32
  }
  func.func @transform_5(%arg0: i32) -> (i32, i32) {
    %c0_i32 = arith.constant 0 : i32
    %c0_i32_0 = arith.constant 0 : i32
    return %arg0, %c0_i32 : i32, i32
  }
}

</mosaic_0001>

<bundles_post_ra>
// kernel: tpu_custom_call.1
= control target key start
LH: loop header
LB: loop body
LE: loop exit
PB: predicated region body
PF: predicated region fallthrough
CT: control target
= control target key end

     0   :  { %10 = vsyncpa [#allocation3], 0  ;;  %s340_s0 = inlined_call_operand.hbm [shape: f32[8,16], index: 0, kind: input, shape index: {}]   ;;  %s341_s1 = inlined_call_operand.hbm [shape: f32[16,128], index: 1, kind: input, shape index: {}]   ;;  %s342_s2 = inlined_call_operand.vmem [shape: f32[1,128], index: 2, kind: input, shape index: {}]   ;;  %s343_s3 = inlined_call_operand.hbm [shape: f32[128,128], index: 3, kind: input, shape index: {}]   ;;  %s344_s4 = inlined_call_operand.vmem [shape: f32[1,128], index: 4, kind: input, shape index: {}]   ;;  %s345_s5 = inlined_call_operand.hbm [shape: f32[8,128], index: 5, kind: output, shape index: {}]  }
   0x1   :  { %11 = vsyncpa [#allocation6], 0  ;;  %s28_s20 = sshll.u32 %s341_s1, 4  ;;  %s29_s20 = int_to_ptr.hbm [resolvable:$true] %s28_s20 }
   0x2   :  { %12 = vsyncpa [#allocation4], 0  ;;  %s286_s21 = smov [#allocation5]   ;;  %s18_s25 = sshll.u32 %s340_s0, 4  ;;  %s19_s25 = int_to_ptr.hbm [resolvable:$true] %s18_s25 }
   0x3   :  { %s30_s22 = sshll.u32 %s286_s21, 4  ;;  %s287_s26 = smov 128   ;;  %s31_s22 = int_to_ptr.vmem [resolvable:$true] %s30_s22 }
   0x4   :  { %s288_s27 = smov 8   ;;  %s289_s28 = smov [#allocation2]  }
   0x5   :  { %36 = dma.hbm_to_vmem [thread:$0]  %s29_s20, 256, %s31_s22, [#allocation6], %s287_s26, %s287_s26, %s288_s27  }
   0x6   :  { %s20_s29 = sshll.u32 %s289_s28, 4  ;;  %s43_s7 = sshll.u32 %s343_s3, 4  ;;  %s21_s29 = int_to_ptr.vmem [resolvable:$true] %s20_s29  ;;  %s44_s7 = int_to_ptr.hbm [resolvable:$true] %s43_s7 }
   0x7   :  { %23 = dma.hbm_to_vmem [thread:$0]  %s19_s25, 128, %s21_s29, [#allocation3]  }
   0x8   :  { %s290_s1 = smov [#allocation7]  }
   0x9   :  { %s45_s8 = sshll.u32 %s290_s1, 4  ;;  %s46_s8 = int_to_ptr.vmem [resolvable:$true] %s45_s8 }
   0xa   :  { %51 = dma.hbm_to_vmem [thread:$0]  %s44_s7, 2048, %s46_s8, [#allocation6], %s287_s26, %s287_s26, %s288_s27  }
   0xb   :  { %280 = dma.done.wait [#allocation3], 128  }
   0xc   :  { %281 = vsyncadd [#allocation3], 4294967168 }
   0xd   :  { %282 = dma.done.wait [#allocation6], 2304  }
   0xe   :  { %283 = vsyncadd [#allocation6], 4294964992  ;;  %v68_v0 = vld [vmem:[#allocation5 + $0x8] sm:$0xff]  ;;  %v67_v1 = vld [vmem:[#allocation5] sm:$0xff]  ;;  %vm73_vm0 = vcmask 130048   ;;  %v138_v23 = vlaneseq }
   0xf   :  { %91 = vmatpush.msra.mxu0 %v68_v0  ;;  %v66_v2 = vld [vmem:[#allocation2] sm:$0xff]  ;;  %v113_v3 = vld [vmem:[#allocation7 + $0x78] sm:$0xff]  ;;  %v112_v4 = vld [vmem:[#allocation7 + $0x70] sm:$0xff] }
  0x10   :  { %118 = vmatpush.msra.mxu1 %v113_v3  ;;  %v111_v5 = vld [vmem:[#allocation7 + $0x68] sm:$0xff]  ;;  %v110_v6 = vld [vmem:[#allocation7 + $0x60] sm:$0xff]  ;;  %v109_v7 = vld [vmem:[#allocation7 + $0x58] sm:$0xff]  ;;  %v139_v24 = vand.u32 127, %v138_v23 }
  0x11   :  { %92 = vmatpush.msra.mxu0 %v67_v1  ;;  %v108_v8 = vld [vmem:[#allocation7 + $0x50] sm:$0xff]  ;;  %v107_v9 = vld [vmem:[#allocation7 + $0x48] sm:$0xff]  ;;  %v106_v10 = vld [vmem:[#allocation7 + $0x40] sm:$0xff] }
  0x12   :  { %171 = vmatmul.msk.f32.vlgmr.msra.gmra.mxu0 %vm73_vm0, %v66_v2  ;;  %119 = vmatpush.msra.mxu1 %v112_v4  ;;  %v105_v11 = vld [vmem:[#allocation7 + $0x38] sm:$0xff]  ;;  %v104_v12 = vld [vmem:[#allocation7 + $0x30] sm:$0xff]  ;;  %v103_v13 = vld [vmem:[#allocation7 + $0x28] sm:$0xff]  ;;  %vm140_vm1 = vcmp.lt.s32.totalorder %v139_v24, 4 }
  0x13   :  { %v102_v14 = vld [vmem:[#allocation7 + $0x20] sm:$0xff]  ;;  %v101_v15 = vld [vmem:[#allocation7 + $0x18] sm:$0xff]  ;;  %v100_v16 = vld [vmem:[#allocation7 + $0x10] sm:$0xff] }
  0x14   :  { %120 = vmatpush.msra.mxu1 %v111_v5  ;;  %v99_v17 = vld [vmem:[#allocation7 + $0x8] sm:$0xff]  ;;  %v98_v18 = vld [vmem:[#allocation7] sm:$0xff] }
  0x15   :  { %v178_v19 = vld [vmem:[%s342_s2] ss:$0 sm:$0xff]  ;;  %s291_s2 = smov [#allocation8]  }
  0x16   :  { %121 = vmatpush.msra.mxu1 %v110_v6  ;;  %v179_v25 = vld [vmem:[%s344_s4] ss:$0 sm:$0xff]  ;;  %s158_s11 = sshll.u32 %s291_s2, 4  ;;  %s160_s4 = sshll.u32 %s345_s5, 4  ;;  %s159_s11 = int_to_ptr.vmem [resolvable:$true] %s158_s11  ;;  %s161_s4 = int_to_ptr.hbm [resolvable:$true] %s160_s4 }
  0x18   :  { %122 = vmatpush.msra.mxu1 %v109_v7 }
  0x1a   :  { %123 = vmatpush.msra.mxu1 %v108_v8 }
  0x1c   :  { %124 = vmatpush.msra.mxu1 %v107_v9 }
  0x1e   :  { %125 = vmatpush.msra.mxu1 %v106_v10 }
  0x20   :  { %126 = vmatpush.msra.mxu1 %v105_v11 }
  0x22   :  { %127 = vmatpush.msra.mxu1 %v104_v12 }
  0x24   :  { %128 = vmatpush.msra.mxu1 %v103_v13 }
  0x26   :  { %129 = vmatpush.msra.mxu1 %v102_v14 }
  0x28   :  { %130 = vmatpush.msra.mxu1 %v101_v15 }
  0x2a   :  { %131 = vmatpush.msra.mxu1 %v100_v16 }
  0x2c   :  { %132 = vmatpush.msra.mxu1 %v99_v17 }
  0x2e   :  { %133 = vmatpush.msra.mxu1 %v98_v18 }
  0x8f   :  { %v94_v20 = vpop.f32.mrf.mxu0 }
  0x90   :  { %v95_v21 = vadd.f32 %v178_v19, %v94_v20 }
  0x92   :  { %v97_v22 = vmax.f32 %v95_v21, 0.0 }
  0x94   :  { %134 = vmatmul.f32.vlgmr.msra.gmra.mxu1 %v97_v22 }
 0x111   :  { %v135_v26 = vpop.f32.mrf.mxu1 }
 0x112   :  { %v136_v27 = vadd.f32 %v179_v25, %v135_v26 }
 0x114   :  { %v141_v28 = vsel %vm140_vm1, %v136_v27, -1e+30 }
 0x115   :  { %142 = vmax.xlane.f32.xlu0 %v141_v28 }
 0x188   :  { %v143_v29 = vpop.xlane.xlu0 %142 }
 0x189   :  { %v144_v30 = vsub.f32 %v141_v28, %v143_v29 }
 0x18b   :  { %v145_v31 = vmul.f32 1.442695, %v144_v30 }
 0x18d   :  { %180 = vpow2.f32 %v145_v31 }
 0x193   :  { %v181_v32 = vpop.eup %180 }
 0x194   :  { %147 = vadd.xlane.f32.xlu0 %v181_v32 }
 0x207   :  { %v148_v33 = vpop.xlane.xlu0 %147 }
 0x208   :  { %182 = vlog2.f32 %v148_v33 }
 0x20e   :  { %v183_v34 = vpop.eup %182 }
 0x20f   :  { %v150_v35 = vmul.f32 0.6931472, %v183_v34 }
 0x211   :  { %v151_v36 = vsub.f32 %v144_v30, %v150_v35 }
 0x213   :  { %152 = vst [vmem:[#allocation8] sm:$0xff] %v151_v36 }
 0x214   :  { %163 = dma.vmem_to_hbm [thread:$0]  %s159_s11, 128, %s161_s4, [#allocation4]  }
 0x215   :  { %284 = dma.done.wait [#allocation4], 128  }
 0x216   :  { %285 = vsyncadd [#allocation4], 4294967168 }
 0x217   :  { %168 = vsyncpa [#allocation3], 1 }
 0x218   :  { %169 = vsyncpa [#allocation6], 1 }
 0x219   :  { %170 = vsyncpa [#allocation4], 1 }

</bundles_post_ra>
